<compile_context>
chip_gen: v7x
topology: tpu7x:2x2x1
jax: 0.10.0
libtpu: 0.0.40
codegen_flags: <defaults>
</compile_context>

<pallas_src>
from typing import Dict, List, Tuple

import jax
import jax.numpy as jnp
from jax.experimental import pallas as pl
from jax.experimental.pallas import tpu as pltpu


def _round_up(x: int, m: int) -> int:
    return ((x + m - 1) // m) * m


# ----------------------------------------------------------------------------
# Pallas kernel: one grid step = one key.
#   y_all[k] = x_all[k] @ w_all[k] + b_all[k]
# where x_all[k] holds the row-concatenation of every descriptor's block for key k.
# ----------------------------------------------------------------------------
def _keyed_linear_kernel(x_ref, w_ref, b_ref, o_ref):
    # x_ref: (M_pad, K_pad), w_ref: (K_pad, N_pad), b_ref: (1, N_pad)
    acc = jnp.dot(x_ref[...], w_ref[...], preferred_element_type=jnp.float32)
    o_ref[...] = (acc + b_ref[...]).astype(o_ref.dtype)


def keyed_linear_pallas(
    x_all: jnp.ndarray,  # (n_keys, M_pad, K_pad)
    w_all: jnp.ndarray,  # (n_keys, K_pad, N_pad)
    b_all: jnp.ndarray,  # (n_keys, 1,     N_pad)
) -> jnp.ndarray:
    """One gridded pallas_call: per-key Linear over key-grouped row slabs."""
    n_keys, M_pad, K_pad = x_all.shape
    nk2, K_pad2, N_pad = w_all.shape
    assert n_keys == nk2 and K_pad == K_pad2
    assert b_all.shape == (n_keys, 1, N_pad)

    cost = pl.CostEstimate(
        flops=2 * n_keys * M_pad * K_pad * N_pad,
        transcendentals=0,
        bytes_accessed=4 * (x_all.size + w_all.size + b_all.size
                            + n_keys * M_pad * N_pad),
    )

    return pl.pallas_call(
        _keyed_linear_kernel,
        out_shape=jax.ShapeDtypeStruct((n_keys, M_pad, N_pad), x_all.dtype),
        grid=(n_keys,),
        in_specs=[
            # Leading key dim squeezed (None) -> 2-D refs in the kernel.
            pl.BlockSpec((None, M_pad, K_pad), lambda i: (i, 0, 0)),
            pl.BlockSpec((None, K_pad, N_pad), lambda i: (i, 0, 0)),
            pl.BlockSpec((None, 1, N_pad), lambda i: (i, 0, 0)),
        ],
        out_specs=pl.BlockSpec((None, M_pad, N_pad), lambda i: (i, 0, 0)),
        compiler_params=pltpu.CompilerParams(
            # Keys are independent -> shard across the two TensorCores on v7x.
            dimension_semantics=("parallel",),
        ),
        cost_estimate=cost,
    )(x_all, w_all, b_all)


# ----------------------------------------------------------------------------
# RhoModel re-implementation (JAX / Pallas)
# ----------------------------------------------------------------------------
class RhoModel:
    """JAX version of rholearn RhoModel.

    `in_keys` are hashable block keys (here: (angular_l, species) tuples).
    The ModuleMap `nn` is realized as one Linear(in_feats -> out_feats) per key.
    Per-key weights live in zero-padded stacks (n_keys, 128, 128); a single
    jitted pack -> Pallas -> unpack pipeline serves every descriptor per call.
    """

    def __init__(
        self,
        in_keys: List[Tuple[int, int]],
        in_properties: Dict[Tuple[int, int], int],    # key -> n_in_features
        out_properties: Dict[Tuple[int, int], int],   # key -> n_out_features
        rng_key: jax.Array,
    ) -> None:
        self._in_keys = list(in_keys)
        self._in_properties = dict(in_properties)
        self._out_properties = dict(out_properties)

        # Pad feature axes to 128 lanes (MXU fill + lane-dense stores).
        self._K_pad = _round_up(max(in_properties.values()), 128)
        self._N_pad = _round_up(max(out_properties.values()), 128)

        # Deterministic parameter init (torch.nn.Linear-style uniform bound).
        self._params: Dict[Tuple[int, int], Dict[str, jnp.ndarray]] = {}
        w_stack, b_stack = [], []
        for key in self._in_keys:
            rng_key, kw, kb = jax.random.split(rng_key, 3)
            fan_in = in_properties[key]
            fan_out = out_properties[key]
            bound = float(1.0 / (fan_in ** 0.5))
            w = jax.random.uniform(kw, (fan_in, fan_out), jnp.float32, -bound, bound)
            b = jax.random.uniform(kb, (fan_out,), jnp.float32, -bound, bound)
            self._params[key] = {"w": w, "b": b}
            # Zero-padded copies for the stacked kernel (padding is a no-op).
            w_stack.append(jnp.pad(
                w, ((0, self._K_pad - fan_in), (0, self._N_pad - fan_out))))
            b_stack.append(jnp.pad(
                b.reshape(1, fan_out), ((0, 0), (0, self._N_pad - fan_out))))
        self._w_all = jnp.stack(w_stack)                 # (n_keys, K_pad, N_pad)
        self._b_all = jnp.stack(b_stack)                 # (n_keys, 1,     N_pad)

        # Jit the whole pack -> kernel -> unpack path.  All packing/unpacking
        # metadata is derived from static input shapes, so it traces to ONE
        # fused XLA computation per descriptor structure (no per-block op storm).
        self._forward_jit = jax.jit(self._packed_forward)

    # ------------------------------------------------------------ jitted path
    def _packed_forward(self, w_all, b_all, descriptors):
        """descriptors: tuple of dicts key -> (samples, components, in_feats)."""
        n_desc = len(descriptors)

        # ---- pack: key-grouped row concatenation, then pad to a common M ----
        x_key_list, spans_per_key = [], []
        for key in self._in_keys:
            rows, spans, offset = [], [], 0
            for d in range(n_desc):
                vals = descriptors[d][key]                # (S, C, F)
                S, C, F = vals.shape
                rows.append(vals.reshape(S * C, F))
                spans.append((d, offset, S, C))
                offset += S * C
            xk = jnp.concatenate(rows, axis=0) if len(rows) > 1 else rows[0]
            x_key_list.append(xk)
            spans_per_key.append(spans)

        M_pad = _round_up(max(xk.shape[0] for xk in x_key_list), 8)
        x_all = jnp.stack([
            jnp.pad(xk, ((0, M_pad - xk.shape[0]), (0, self._K_pad - xk.shape[1])))
            for xk in x_key_list
        ])                                                # (n_keys, M_pad, K_pad)

        # ---- single Pallas call over keys ----
        y_all = keyed_linear_pallas(x_all, w_all, b_all)  # (n_keys, M_pad, N_pad)

        # ---- unpack: static-index slices back to per-descriptor blocks ----
        out = [dict() for _ in range(n_desc)]
        for ki, key in enumerate(self._in_keys):
            n_out = self._out_properties[key]
            for (d, start, S, C) in spans_per_key[ki]:
                out[d][key] = y_all[ki, start:start + S * C, :n_out].reshape(S, C, n_out)
        return tuple(out)

    # The ModuleMap: apply per-key Linear to every block of every descriptor.
    def _nn(self, descriptor: List[Dict[Tuple[int, int], jnp.ndarray]]) -> List[Dict]:
        return list(self._forward_jit(self._w_all, self._b_all, tuple(descriptor)))

    # --------------------------------------------------------------- forward
    def forward(self, descriptor=None, check_metadata: bool = False) -> List:
        if descriptor is None:
            raise ValueError("`descriptor` must be provided")
        if isinstance(descriptor, tuple):
            descriptor = list(descriptor)
        if not isinstance(descriptor, list):
            raise ValueError(
                f"Expected `descriptor` to be list or tuple, got {type(descriptor)}"
            )
        if check_metadata:
            for desc in descriptor:
                for key in self._in_keys:
                    if desc[key].shape[-1] != self._in_properties[key]:
                        raise ValueError(
                            f"properties not consistent between model and descriptor at key {key}"
                        )
        # TODO(synk): the `system is not None` branch calls a rascaline descriptor
        # calculator (SOAP/ACDC features); no Pallas equivalent — descriptors are
        # expected precomputed, as in this `descriptor=` code path.
        return self._nn(descriptor)

    def predict(self, descriptor=None) -> List:
        # eval()/no_grad() are no-ops in this functional JAX setting.
        return self.forward(descriptor=descriptor, check_metadata=True)

    __call__ = forward


# ----------------------------------------------------------------------------
# Demo / smoke test
# ----------------------------------------------------------------------------
if __name__ == "__main__":
    root = jax.random.PRNGKey(0)

    # Keys (angular_l, species) as in rholearn basis decompositions.
    in_keys = [(0, 1), (1, 1), (2, 1)]
    in_properties = {k: 32 for k in in_keys}    # n input features per key
    out_properties = {k: 16 for k in in_keys}   # n output (basis) features per key

    model_key, data_key = jax.random.split(root)
    model = RhoModel(in_keys, in_properties, out_properties, rng_key=model_key)

    # Build a list of 2 descriptors (e.g. 2 structures), each a dict of blocks
    # with shape (samples=8, components=2l+1, in_features=32).
    n_samples = 8
    descriptors = []
    for _ in range(2):
        desc = {}
        for (l, a) in in_keys:
            data_key, sub = jax.random.split(data_key)
            desc[(l, a)] = jax.random.normal(
                sub, (n_samples, 2 * l + 1, in_properties[(l, a)]), jnp.float32
            )
        descriptors.append(desc)

    preds = model.predict(descriptor=descriptors)
    jax.block_until_ready(preds)

    # Cross-check against plain-JAX reference (same semantics as torch Linear).
    for desc, pred in zip(descriptors, preds):
        for key in in_keys:
            p = model._params[key]
            ref = jnp.einsum("scf,fo->sco", desc[key], p["w"]) + p["b"]
            assert pred[key].shape == ref.shape, (pred[key].shape, ref.shape)
            assert jnp.allclose(pred[key], ref, atol=1e-4, rtol=1e-4)

    print("KERNEL_OK")
</pallas_src>

<mosaic_0001>
module attributes {stable_mosaic.version = 11 : i64} {
  func.func @_keyed_linear_kernel(%arg0: i32, %arg1: memref<1x80x128xf32, #tpu.memory_space<vmem>>, %arg2: memref<1x128x128xf32, #tpu.memory_space<vmem>>, %arg3: memref<1x1x128xf32, #tpu.memory_space<vmem>>, %arg4: memref<1x80x128xf32, #tpu.memory_space<vmem>>) attributes {dimension_semantics = [#tpu.dimension_semantics<parallel>], iteration_bounds = array<i64: 3>, scalar_prefetch = 0 : i64, scratch_operands = 0 : i64, tpu.core_type = #tpu.core_type<tc>, window_params = [{transform_indices = @transform_0, window_bounds = array<i64: 1, 80, 128>}, {transform_indices = @transform_1, window_bounds = array<i64: 1, 128, 128>}, {transform_indices = @transform_2, window_bounds = array<i64: 1, 1, 128>}, {transform_indices = @transform_3, window_bounds = array<i64: 1, 80, 128>}]} {
    %c0 = arith.constant 0 : index
    %c0_0 = arith.constant 0 : index
    %c0_1 = arith.constant 0 : index
    %0 = vector.load %arg1[%c0, %c0_0, %c0_1] : memref<1x80x128xf32, #tpu.memory_space<vmem>>, vector<1x80x128xf32>
    %1 = vector.shape_cast %0 : vector<1x80x128xf32> to vector<80x128xf32>
    %c0_2 = arith.constant 0 : index
    %c0_3 = arith.constant 0 : index
    %c0_4 = arith.constant 0 : index
    %2 = vector.load %arg2[%c0_2, %c0_3, %c0_4] : memref<1x128x128xf32, #tpu.memory_space<vmem>>, vector<1x128x128xf32>
    %3 = vector.shape_cast %2 : vector<1x128x128xf32> to vector<128x128xf32>
    %cst = arith.constant dense<0.000000e+00> : vector<80x128xf32>
    %4 = tpu.matmul %1, %3, %cst {dimension_numbers = #tpu.dot_dimension_numbers<[1], [0], [0], [1], [0, 0, 1, 1], [], []>} : vector<80x128xf32>, vector<128x128xf32>, vector<80x128xf32> -> vector<80x128xf32>
    %c0_5 = arith.constant 0 : index
    %c0_6 = arith.constant 0 : index
    %c0_7 = arith.constant 0 : index
    %5 = vector.load %arg3[%c0_5, %c0_6, %c0_7] : memref<1x1x128xf32, #tpu.memory_space<vmem>>, vector<1x1x128xf32>
    %6 = vector.shape_cast %5 : vector<1x1x128xf32> to vector<1x128xf32>
    %7 = vector.broadcast %6 : vector<1x128xf32> to vector<80x128xf32>
    %8 = arith.addf %4, %7 : vector<80x128xf32>
    %c0_8 = arith.constant 0 : index
    %c0_9 = arith.constant 0 : index
    %c0_10 = arith.constant 0 : index
    %9 = vector.load %arg4[%c0_8, %c0_9, %c0_10] : memref<1x80x128xf32, #tpu.memory_space<vmem>>, vector<1x80x128xf32>
    %10 = vector.shape_cast %9 : vector<1x80x128xf32> to vector<80x128xf32>
    %11 = vector.shape_cast %8 : vector<80x128xf32> to vector<1x80x128xf32>
    tpu.vector_store %arg4[%c0_8, %c0_9, %c0_10], %11 {strides = array<i32>} : memref<1x80x128xf32, #tpu.memory_space<vmem>>, vector<1x80x128xf32>,
    return
  }
  func.func @transform_0(%arg0: i32) -> (i32, i32, i32) {
    %c0_i32 = arith.constant 0 : i32
    %c0_i32_0 = arith.constant 0 : i32
    %c0_i32_1 = arith.constant 0 : i32
    return %arg0, %c0_i32, %c0_i32_0 : i32, i32, i32
  }
  func.func @transform_1(%arg0: i32) -> (i32, i32, i32) {
    %c0_i32 = arith.constant 0 : i32
    %c0_i32_0 = arith.constant 0 : i32
    %c0_i32_1 = arith.constant 0 : i32
    return %arg0, %c0_i32, %c0_i32_0 : i32, i32, i32
  }
  func.func @transform_2(%arg0: i32) -> (i32, i32, i32) {
    %c0_i32 = arith.constant 0 : i32
    %c0_i32_0 = arith.constant 0 : i32
    %c0_i32_1 = arith.constant 0 : i32
    return %arg0, %c0_i32, %c0_i32_0 : i32, i32, i32
  }
  func.func @transform_3(%arg0: i32) -> (i32, i32, i32) {
    %c0_i32 = arith.constant 0 : i32
    %c0_i32_0 = arith.constant 0 : i32
    %c0_i32_1 = arith.constant 0 : i32
    return %arg0, %c0_i32, %c0_i32_0 : i32, i32, i32
  }
}

</mosaic_0001>

<bundles_post_ra>
// kernel: squeeze.9
= control target key start
LH: loop header
LB: loop body
LE: loop exit
PB: predicated region body
PF: predicated region fallthrough
CT: control target
= control target key end

     0   :  { %vm3_vm0 = vcmask 130048   ;;  %s134_s0 = inlined_call_operand.vmem [shape: f32[1,24,16], index: 0, kind: input, shape index: {}]   ;;  %s135_s1 = inlined_call_operand.vmem [shape: f32[8,3,16], index: 1, kind: output, shape index: {}]  }
   0x1   :  { %v2_v0 = vld [vmem:[%s134_s0] sm:$0xff]   ;;  %v82_v1 = vld [vmem:[%s134_s0 + $0x8] sm:$0xff]   ;;  %v83_v2 = vld [vmem:[%s134_s0 + $0x10] sm:$0xff]  }
   0x2   :  { %4 = vst.msk [vmem:[#allocation0] sm:$0x7] %vm3_vm0, %v2_v0   ;;  %6 = vst.msk [vmem:[#allocation0 + $0x5] sm:$0x38] %vm3_vm0, %v2_v0  }
   0x3   :  { %8 = vst.msk [vmem:[#allocation0 + $0xa] sm:$0xc0] %vm3_vm0, %v2_v0   ;;  %13 = vst.msk [vmem:[#allocation0 + $0x12] ss:$6 sm:$0x3] %vm3_vm0, %v82_v1  }
   0x4   :  { %15 = vst.msk [vmem:[#allocation0 + $0x17] sm:$0xc] %vm3_vm0, %v82_v1   ;;  %17 = vst.msk [vmem:[#allocation0 + $0x1c] sm:$0x70] %vm3_vm0, %v82_v1  }
   0x5   :  { %19 = vst.msk [vmem:[#allocation0 + $0x21] sm:$0x80] %vm3_vm0, %v82_v1   ;;  %24 = vst.msk [vmem:[#allocation0 + $0x29] sm:$0x3] %vm3_vm0, %v83_v2  }
   0x6   :  { %26 = vst.msk [vmem:[#allocation0 + $0x2e] sm:$0x1c] %vm3_vm0, %v83_v2   ;;  %28 = vst.msk [vmem:[#allocation0 + $0x33] sm:$0xe0] %vm3_vm0, %v83_v2  }
   0x9   :  { %v32_v3 = vld [vmem:[#allocation0] sm:$0xf]  ;;  %v36_v4 = vld [vmem:[#allocation0 + $0x8] sm:$0xf] }
   0xa   :  { %v41_v5 = vld [vmem:[#allocation0 + $0x10] sm:$0xf]  ;;  %34 = vst [vmem:[%s135_s1] sm:$0xf] %v32_v3  ;;  %84 = vst [vmem:[%s135_s1 + $0x4] sm:$0xf] %v36_v4 }
   0xb   :  { %85 = vst [vmem:[%s135_s1 + $0x8] sm:$0xf] %v41_v5  ;;  %v47_v6 = vld [vmem:[#allocation0 + $0x18] sm:$0xf]  ;;  %v53_v7 = vld [vmem:[#allocation0 + $0x20] sm:$0xf] }
   0xc   :  { %v59_v8 = vld [vmem:[#allocation0 + $0x28] sm:$0xf]  ;;  %86 = vst [vmem:[%s135_s1 + $0xc] sm:$0xf] %v47_v6  ;;  %87 = vst [vmem:[%s135_s1 + $0x10] sm:$0xf] %v53_v7 }
   0xd   :  { %88 = vst [vmem:[%s135_s1 + $0x14] sm:$0xf] %v59_v8  ;;  %v65_v9 = vld [vmem:[#allocation0 + $0x30] sm:$0xf]  ;;  %v71_v10 = vld [vmem:[#allocation0 + $0x38] sm:$0xf] }
   0xe   :  { %89 = vst [vmem:[%s135_s1 + $0x18] sm:$0xf] %v65_v9  ;;  %90 = vst [vmem:[%s135_s1 + $0x1c] sm:$0xf] %v71_v10 }

// kernel: squeeze.11
= control target key start
LH: loop header
LB: loop body
LE: loop exit
PB: predicated region body
PF: predicated region fallthrough
CT: control target
= control target key end

     0   :  { %vm3_vm0 = vcmask 130048   ;;  %s127_s0 = inlined_call_operand.vmem [shape: f32[1,40,16], index: 0, kind: input, shape index: {}]   ;;  %s128_s1 = inlined_call_operand.vmem [shape: f32[8,5,16], index: 1, kind: output, shape index: {}]  }
   0x1   :  { %v2_v0 = vld [vmem:[%s127_s0] sm:$0xff]   ;;  %v40_v1 = vld [vmem:[%s127_s0 + $0x8] sm:$0xff]   ;;  %v44_v2 = vld [vmem:[%s127_s0 + $0x10] sm:$0xff]  }
   0x2   :  { %4 = vst.msk [vmem:[%s128_s1] sm:$0x1f] %vm3_vm0, %v2_v0   ;;  %39 = vst.msk [vmem:[%s128_s1 + $0x3] sm:$0xe0] %vm3_vm0, %v2_v0   ;;  %v47_v3 = vld [vmem:[%s127_s0 + $0x18] sm:$0xff]   ;;  %v51_v4 = vld [vmem:[%s127_s0 + $0x20] sm:$0xff]  }
   0x3   :  { %41 = vst.msk [vmem:[%s128_s1 + $0xb] sm:$0x3] %vm3_vm0, %v40_v1   ;;  %42 = vst.msk [vmem:[%s128_s1 + $0xe] sm:$0x7c] %vm3_vm0, %v40_v1  }
   0x4   :  { %43 = vst.msk [vmem:[%s128_s1 + $0x11] sm:$0x80] %vm3_vm0, %v40_v1   ;;  %45 = vst.msk [vmem:[%s128_s1 + $0x19] sm:$0xf] %vm3_vm0, %v44_v2  }
   0x5   :  { %46 = vst.msk [vmem:[%s128_s1 + $0x1c] sm:$0xf0] %vm3_vm0, %v44_v2   ;;  %48 = vst.msk [vmem:[%s128_s1 + $0x24] ss:$4 sm:$0x3] %vm3_vm0, %v47_v3  }
   0x6   :  { %49 = vst.msk [vmem:[%s128_s1 + $0x27] sm:$0x3c] %vm3_vm0, %v47_v3   ;;  %50 = vst.msk [vmem:[%s128_s1 + $0x2a] sm:$0xc0] %vm3_vm0, %v47_v3  }
   0x7   :  { %52 = vst.msk [vmem:[%s128_s1 + $0x32] sm:$0x7] %vm3_vm0, %v51_v4   ;;  %53 = vst.msk [vmem:[%s128_s1 + $0x35] sm:$0xf8] %vm3_vm0, %v51_v4  }

// kernel: _packed_forward.1
= control target key start
LH: loop header
LB: loop body
LE: loop exit
PB: predicated region body
PF: predicated region fallthrough
CT: control target
= control target key end

     0   :  { %s610_s12 = smov 0   ;;  %s672_s0 = inlined_call_operand.vmem [shape: f32[3,80,128], index: 0, kind: input, shape index: {}]   ;;  %s673_s1 = inlined_call_operand.vmem [shape: f32[3,128,128], index: 1, kind: input, shape index: {}]   ;;  %s674_s2 = inlined_call_operand.vmem [shape: f32[3,1,128], index: 2, kind: input, shape index: {}]   ;;  %s675_s3 = inlined_call_operand.vmem [shape: f32[3,80,128], index: 3, kind: output, shape index: {}]  }
   0x1 LB: > { %s439_s13 = sadd.s32 4294967295, %s588_s12   ;;  %p443_p0 = scmp.ge.s32.totalorder %s588_s12, 1  ;;  %s588_s12 = sphi %s610_s12, %s13_s12  }
   0x2   : > { %p155_p1 = scmp.lt.s32.totalorder %s588_s12, 4 }
   0x4   : > { %p156_p2 = pnand %p443_p0, %p155_p1 }
   0x5   : > { %p187_p3 = scmp.lt.s32.totalorder (!%p156_p2), %s439_s13, 2 }
   0x6   : > { %159 = sbr.rel (%p156_p2) target bundleno = 275 (0x113), region = 32 }
   0xd   : > { %s677_s13 = smov (!%p187_p3, %s439_s13), 2 }
   0xe   : > { %s451_s14 = sshll.u32 %s677_s13, 7  ;;  %s573_s15 = smul.u32 80, %s677_s13 }
   0xf   : > { %s625_s18 = scalar_lea.vmem %s673_s1, %s451_s14  ;;  %s199_s24 = scalar_lea.vmem %s674_s2, %s677_s13 }
  0x10   : > { %v215_v0 = vld [vmem:[%s625_s18] sm:$0xff]  ;;  %v216_v1 = vld [vmem:[%s625_s18 + $0x8] sm:$0xff]  ;;  %v217_v2 = vld [vmem:[%s625_s18 + $0x10] sm:$0xff]  ;;  %s638_s21 = scalar_lea.vmem %s672_s0, %s573_s15  ;;  %s204_s27 = scalar_lea.vmem %s675_s3, %s573_s15 }
  0x11   : > { %v525_v3 = vpack.c.bf16 %v216_v1, %v215_v0  ;;  %v218_v4 = vld [vmem:[%s625_s18 + $0x18] sm:$0xff]  ;;  %v219_v6 = vld [vmem:[%s625_s18 + $0x20] sm:$0xff]  ;;  %v220_v7 = vld [vmem:[%s625_s18 + $0x28] sm:$0xff] }
  0x12   : > { %v529_v5 = vpack.c.bf16 %v218_v4, %v217_v2  ;;  %v533_v8 = vpack.c.bf16 %v220_v7, %v219_v6  ;;  %v205_v9 = vld [vmem:[%s638_s21] sm:$0xff]  ;;  %v221_v10 = vld [vmem:[%s625_s18 + $0x30] sm:$0xff]  ;;  %v222_v11 = vld [vmem:[%s625_s18 + $0x38] sm:$0xff] }
  0x13   : > { %526 = vmatprep.subr.bf16.mxu0 %v525_v3  ;;  %557 = vmatprep.subr.bf16.mxu1 %v525_v3  ;;  %v211_v12 = vld [vmem:[%s638_s21 + $0x30] sm:$0xff]  ;;  %v537_v13 = vpack.c.bf16 %v222_v11, %v221_v10  ;;  %v223_v14 = vld [vmem:[%s625_s18 + $0x40] sm:$0xff]  ;;  %v224_v15 = vld [vmem:[%s625_s18 + $0x48] sm:$0xff] }
  0x14   : > { %528 = vmatpush3.bf16.msra.mxu0 %v525_v3  ;;  %565 = vmatpush3.bf16.msra.mxu1 %v525_v3  ;;  %v541_v16 = vpack.c.bf16 %v224_v15, %v223_v14  ;;  %v225_v17 = vld [vmem:[%s625_s18 + $0x50] sm:$0xff]  ;;  %v226_v18 = vld [vmem:[%s625_s18 + $0x58] sm:$0xff]  ;;  %v227_v20 = vld [vmem:[%s625_s18 + $0x60] sm:$0xff] }
  0x15   : > { %530 = vmatprep.subr.bf16.mxu0 %v529_v5  ;;  %558 = vmatprep.subr.bf16.mxu1 %v529_v5  ;;  %v545_v19 = vpack.c.bf16 %v226_v18, %v225_v17  ;;  %v228_v21 = vld [vmem:[%s625_s18 + $0x68] sm:$0xff]  ;;  %v229_v23 = vld [vmem:[%s625_s18 + $0x70] sm:$0xff]  ;;  %v230_v24 = vld [vmem:[%s625_s18 + $0x78] sm:$0xff] }
  0x16   : > { %510 = vmatprep.mubr.f32.mxu0 %v205_v9  ;;  %519 = vmatprep.mubr.f32.mxu1 %v211_v12  ;;  %v549_v22 = vpack.c.bf16 %v228_v21, %v227_v20  ;;  %v553_v25 = vpack.c.bf16 %v230_v24, %v229_v23  ;;  %v206_v26 = vld [vmem:[%s638_s21 + $0x8] sm:$0xff]  ;;  %v212_v27 = vld [vmem:[%s638_s21 + $0x38] sm:$0xff]  ;;  %v207_v28 = vld [vmem:[%s638_s21 + $0x10] sm:$0xff] }
  0x17   : > { %v213_v29 = vld [vmem:[%s638_s21 + $0x40] sm:$0xff]  ;;  %v208_v30 = vld [vmem:[%s638_s21 + $0x18] sm:$0xff]  ;;  %v214_v31 = vld [vmem:[%s638_s21 + $0x48] sm:$0xff] }
  0x18   : > { %532 = vmatpush3.bf16.msra.mxu0 %v529_v5  ;;  %566 = vmatpush3.bf16.msra.mxu1 %v529_v5  ;;  %v209_v32 = vld [vmem:[%s638_s21 + $0x20] sm:$0xff]  ;;  %v210_v33 = vld [vmem:[%s638_s21 + $0x28] sm:$0xff] }
  0x19   : > { %534 = vmatprep.subr.bf16.mxu0 %v533_v8  ;;  %559 = vmatprep.subr.bf16.mxu1 %v533_v8  ;;  %v448_v34 = vld [vmem:[%s199_s24] ss:$0 sm:$0xff] }
  0x1c   : > { %536 = vmatpush3.bf16.msra.mxu0 %v533_v8  ;;  %567 = vmatpush3.bf16.msra.mxu1 %v533_v8 }
  0x1d   : > { %538 = vmatprep.subr.bf16.mxu0 %v537_v13  ;;  %560 = vmatprep.subr.bf16.mxu1 %v537_v13 }
  0x20   : > { %540 = vmatpush3.bf16.msra.mxu0 %v537_v13  ;;  %568 = vmatpush3.bf16.msra.mxu1 %v537_v13 }
  0x21   : > { %542 = vmatprep.subr.bf16.mxu0 %v541_v16  ;;  %561 = vmatprep.subr.bf16.mxu1 %v541_v16 }
  0x24   : > { %544 = vmatpush3.bf16.msra.mxu0 %v541_v16  ;;  %569 = vmatpush3.bf16.msra.mxu1 %v541_v16 }
  0x25   : > { %546 = vmatprep.subr.bf16.mxu0 %v545_v19  ;;  %562 = vmatprep.subr.bf16.mxu1 %v545_v19 }
  0x28   : > { %548 = vmatpush3.bf16.msra.mxu0 %v545_v19  ;;  %570 = vmatpush3.bf16.msra.mxu1 %v545_v19 }
  0x29   : > { %550 = vmatprep.subr.bf16.mxu0 %v549_v22  ;;  %563 = vmatprep.subr.bf16.mxu1 %v549_v22 }
  0x2c   : > { %552 = vmatpush3.bf16.msra.mxu0 %v549_v22  ;;  %571 = vmatpush3.bf16.msra.mxu1 %v549_v22 }
  0x2d   : > { %554 = vmatprep.subr.bf16.mxu0 %v553_v25  ;;  %564 = vmatprep.subr.bf16.mxu1 %v553_v25 }
  0x30   : > { %556 = vmatpush3.bf16.msra.mxu0 %v553_v25  ;;  %572 = vmatpush3.bf16.msra.mxu1 %v553_v25 }
  0x33   : > { %511 = vmatmul.mubr.f32.vlgmr.msra.gmra.mrb[0].mxu0 %v206_v26  ;;  %520 = vmatmul.mubr.f32.vlgmr.msra.gmra.mrb[0].mxu1 %v212_v27 }
  0x34   : > { %513 = vmatprep.mubr.f32.mxu0 %v207_v28  ;;  %522 = vmatprep.mubr.f32.mxu1 %v213_v29 }
  0x37   : > { %514 = vmatmul.mubr.f32.gmra.mrb[2].mxu0 %v208_v30  ;;  %523 = vmatmul.mubr.f32.gmra.mrb[2].mxu1 %v214_v31 }
  0x38   : > { %516 = vmatprep.mubr.f32.mxu0 %v209_v32 }
  0x3b   : > { %517 = vmatmul.mubr.f32.gmra.mrb[4].mxu0 %v210_v33 }
 0x106   : > { %v512_v35 = vpop.f32.mrb[0].mxu0  ;;  %v521_v36 = vpop.f32.mrb[0].mxu1 }
 0x107   : > { %v310_v37 = vadd.f32 %v512_v35, %v448_v34  ;;  %v304_v38 = vpop.f32.mrb[1].mxu0  ;;  %v340_v39 = vadd.f32 %v521_v36, %v448_v34  ;;  %v334_v40 = vpop.f32.mrb[1].mxu1 }
 0x108   : > { %v305_v41 = vadd.f32 %v448_v34, %v304_v38  ;;  %v335_v42 = vadd.f32 %v448_v34, %v334_v40 }
 0x109   : > { %354 = vst [vmem:[%s204_s27 + $0x8] sm:$0xff] %v310_v37  ;;  %360 = vst [vmem:[%s204_s27 + $0x38] sm:$0xff] %v340_v39 }
 0x10a   : > { %353 = vst [vmem:[%s204_s27] sm:$0xff] %v305_v41  ;;  %v515_v43 = vpop.f32.mrb[2].mxu0  ;;  %359 = vst [vmem:[%s204_s27 + $0x30] sm:$0xff] %v335_v42  ;;  %v524_v44 = vpop.f32.mrb[2].mxu1 }
 0x10b   : > { %v320_v45 = vadd.f32 %v515_v43, %v448_v34  ;;  %v314_v46 = vpop.f32.mrb[3].mxu0  ;;  %v350_v47 = vadd.f32 %v524_v44, %v448_v34  ;;  %v344_v48 = vpop.f32.mrb[3].mxu1 }
 0x10c   : > { %v315_v49 = vadd.f32 %v448_v34, %v314_v46  ;;  %v345_v50 = vadd.f32 %v448_v34, %v344_v48 }
 0x10d   : > { %356 = vst [vmem:[%s204_s27 + $0x18] sm:$0xff] %v320_v45  ;;  %362 = vst [vmem:[%s204_s27 + $0x48] sm:$0xff] %v350_v47 }
 0x10e   : > { %355 = vst [vmem:[%s204_s27 + $0x10] sm:$0xff] %v315_v49  ;;  %v518_v51 = vpop.f32.mrb[4].mxu0  ;;  %361 = vst [vmem:[%s204_s27 + $0x40] sm:$0xff] %v345_v50 }
 0x10f   : > { %v330_v52 = vadd.f32 %v518_v51, %v448_v34  ;;  %v324_v53 = vpop.f32.mrb[5].mxu0 }
 0x110   : > { %v325_v54 = vadd.f32 %v448_v34, %v324_v53 }
 0x111   : > { %358 = vst [vmem:[%s204_s27 + $0x28] sm:$0xff] %v330_v52 }
 0x112   : > { %357 = vst [vmem:[%s204_s27 + $0x20] sm:$0xff] %v325_v54 }
 0x113 PF: > { %s13_s12 = sadd.s32 1, %s588_s12  }
 0x114   : > { %p10_p4 = scmp.ge.s32.totalorder %s13_s12, 5  }
 0x116   :  { %12 = sbr.rel (!%p10_p4) target bundleno = 1 (0x1), region = 68 }

</bundles_post_ra>
